<compile_context>
chip_gen: v7x
topology: tpu7x:2x2x1
jax: 0.10.0
libtpu: 0.0.40
codegen_flags: <defaults>
</compile_context>

<pallas_src>
import functools

import jax
import jax.numpy as jnp
from jax.experimental import pallas as pl
from jax.experimental.pallas import tpu as pltpu


def _round_up(x, m):
    return ((x + m - 1) // m) * m


def _vmem_capacity_bytes():
    """Physical VMEM per TensorCore (generation aware); conservative fallback."""
    try:
        info = pltpu.get_tpu_info()
        cap = getattr(info, "vmem_capacity_bytes", None)
        if cap:
            return int(cap)
    except Exception:
        pass
    return 64 << 20  # v7x per-core VMEM; safe lower bound for v5e/v6e as well


def _wsum_kernel(*refs, use_cnts, has_idf, eps):
    if has_idf:
        _tids_ref, nt_ref, bow_ref, idf_ref, emb_ref, out_ref, den_ref = refs
    else:
        _tids_ref, nt_ref, bow_ref, emb_ref, out_ref, den_ref = refs
        idf_ref = None
    # _tids_ref is only consumed by the index_maps.

    k = pl.program_id(2)  # touched-vocab-tile (reduction) axis -- last grid dimension

    @pl.when(k == 0)
    def _init():
        out_ref[...] = jnp.zeros_like(out_ref)
        den_ref[...] = jnp.zeros_like(den_ref)

    @pl.when(k < nt_ref[0])  # skip the duplicated tail tiles of the sparse schedule
    def _accumulate():
        counts = bow_ref[...]                                    # (tb, tv) int32
        if use_cnts:
            w = counts.astype(jnp.float32)
        else:
            w = (counts > 0).astype(jnp.float32)
        if idf_ref is not None:
            w = w * idf_ref[...].astype(jnp.float32)             # (1, tv) broadcast over batch
        # Keep w in f32 (counts*idf precision); upcast the emb tile on-chip -- the HBM
        # stream stays in the table's native (e.g. bf16) dtype, which is what matters here.
        emb = emb_ref[...].astype(jnp.float32)                   # (tv, td)
        out_ref[...] += jnp.dot(w, emb, preferred_element_type=jnp.float32)   # (tb, td) f32
        den_ref[...] += jnp.sum(w, axis=-1, keepdims=True)                    # (tb, 1)

    @pl.when(k == pl.num_programs(2) - 1)
    def _finalize():
        out_ref[...] = out_ref[...] / jnp.maximum(den_ref[...], eps)


def weighted_sum_encoder(bow, word_embeds, idf=None, use_cnts=False, *,
                         token_ids=None, tile_v=None, tile_d=None, tile_b=None,
                         eps=1e-9):
    """bow: (B, V) counts; word_embeds: (V, D); idf: (V,) or None.
    token_ids: optional (B, L) ids -> enables the block-sparse vocab-tile schedule.
    Returns (B, D) float32."""
    B, V = bow.shape
    Vw, D = word_embeds.shape
    assert V == Vw, "bow vocab dim must match embedding table"
    has_idf = idf is not None
    emb_bytes = jnp.dtype(word_embeds.dtype).itemsize
    idf_bytes = jnp.dtype(idf.dtype).itemsize if has_idf else 0
    bow_bytes = jnp.dtype(bow.dtype).itemsize

    # ---- generation-aware sizing -------------------------------------------------------
    vmem_cap = _vmem_capacity_bytes()
    vmem_budget = int(0.65 * vmem_cap)

    # D stripes: gives the 'parallel' D axis >1 program (keeps both v7x TensorCores busy)
    # when the embedding dim is large enough.
    if tile_d is None:
        tile_d = D // 2 if (D >= 256 and D % 256 == 0) else D
    assert D % tile_d == 0 and (tile_d == D or tile_d % 128 == 0)
    n_d = D // tile_d

    # Batch tiling: keeps the resident f32 accumulator and bow block bounded for large B,
    # and adds a second parallel axis when D cannot be split.
    if tile_b is None:
        tile_b = B if B <= 128 else 128
    n_b = pl.cdiv(B, tile_b)
    Bp = n_b * tile_b

    # Vocab tile: target a multi-MiB embedding tile per grid step (amortizes the ~0.35us
    # per-step overhead against the HBM stream), bounded by the VMEM budget.
    if tile_v is None:
        target_tile_bytes = (4 << 20) if vmem_cap >= (96 << 20) else (2 << 20)
        tv = target_tile_bytes // max(1, tile_d * emb_bytes)
        fixed = 2 * tile_b * tile_d * 4 + tile_b * 128 * 4           # out dbl-buf + den scratch
        per_v = (2 * tile_b * bow_bytes + tile_b * 4                 # bow dbl-buf + f32 w copy
                 + 2 * tile_d * emb_bytes + tile_d * 4               # emb dbl-buf + f32 upcast
                 + 3 * idf_bytes)
        tv = min(tv, max(0, vmem_budget - fixed) // max(1, per_v))
        tile_v = max(512, (int(tv) // 128) * 128)
    else:
        tile_v = max(128, (int(tile_v) // 128) * 128)
    tile_v = min(tile_v, _round_up(V, 128))

    n_v = pl.cdiv(V, tile_v)
    Vp = n_v * tile_v

    # ---- padding (zero rows/cols contribute nothing) -----------------------------------
    if Vp != V:
        pad = Vp - V
        bow = jnp.pad(bow, ((0, 0), (0, pad)))
        word_embeds = jnp.pad(word_embeds, ((0, pad), (0, 0)))
        if has_idf:
            idf = jnp.pad(idf, ((0, pad),))
    if Bp != B:
        bow = jnp.pad(bow, ((0, Bp - B), (0, 0)))

    # ---- block-sparse vocab-tile schedule (scalar prefetch) ----------------------------
    if token_ids is not None:
        flat = jnp.clip(token_ids.reshape(-1).astype(jnp.int32), 0, V - 1)
        max_tiles = max(1, min(n_v, int(flat.shape[0])))             # static upper bound
        touched = jnp.zeros((n_v,), jnp.bool_).at[flat // tile_v].set(True)
        (tids,) = jnp.nonzero(touched, size=max_tiles, fill_value=0)
        n_touched = jnp.sum(touched).astype(jnp.int32)
        last = jnp.maximum(n_touched - 1, 0)
        # Pad the tail with the last valid tile id: block index unchanged -> no extra DMA.
        tids = jnp.where(jnp.arange(max_tiles) < n_touched, tids, tids[last]).astype(jnp.int32)
    else:
        max_tiles = n_v
        tids = jnp.arange(n_v, dtype=jnp.int32)
        n_touched = n_v
    nt_arr = jnp.reshape(jnp.asarray(n_touched, dtype=jnp.int32), (1,))
    n_k = max_tiles

    # ---- embedding layout: contiguous (n_d, Vp, tile_d) stripes when D is split --------
    if n_d > 1:
        emb_arg = word_embeds.reshape(Vp, n_d, tile_d).transpose(1, 0, 2)
        emb_spec = pl.BlockSpec((None, tile_v, tile_d),
                                lambda b, d, k, t, n: (d, t[k], 0))
    else:
        emb_arg = word_embeds
        emb_spec = pl.BlockSpec((tile_v, tile_d),
                                lambda b, d, k, t, n: (t[k], 0))

    in_specs = [pl.BlockSpec((tile_b, tile_v), lambda b, d, k, t, n: (b, t[k]))]   # bow tile
    args = [bow]
    if has_idf:
        in_specs.append(pl.BlockSpec((1, tile_v), lambda b, d, k, t, n: (0, t[k])))  # idf tile
        args.append(idf.reshape(1, Vp))                       # native dtype, cast in-kernel
    in_specs.append(emb_spec)
    args.append(emb_arg)

    # ---- VMEM limit: sized to the footprint, capped at 75% of physical (v7x safe) ------
    est = (2 * tile_b * tile_v * bow_bytes
           + (3 * tile_v * idf_bytes if has_idf else 0)
           + 2 * tile_v * tile_d * emb_bytes + tile_v * tile_d * 4
           + 2 * tile_b * tile_d * 4
           + tile_b * 128 * 4)
    vmem_limit = int(min(max(2 * est + (2 << 20), 32 << 20), int(0.75 * vmem_cap)))

    kernel = functools.partial(_wsum_kernel, use_cnts=use_cnts, has_idf=has_idf, eps=eps)
    out = pl.pallas_call(
        kernel,
        out_shape=jax.ShapeDtypeStruct((Bp, D), jnp.float32),
        grid_spec=pltpu.PrefetchScalarGridSpec(
            num_scalar_prefetch=2,                 # tids (tile schedule), n_touched
            grid=(n_b, n_d, n_k),                  # vocab-tile reduction axis last
            in_specs=in_specs,
            out_specs=pl.BlockSpec((tile_b, tile_d), lambda b, d, k, t, n: (b, d)),
            scratch_shapes=[
                pltpu.VMEM((tile_b, 1), jnp.float32),   # denominator accumulator
            ],
        ),
        compiler_params=pltpu.CompilerParams(
            dimension_semantics=("parallel", "parallel", "arbitrary"),
            vmem_limit_bytes=vmem_limit,
        ),
    )(tids, nt_arr, *args)
    return out[:B] if Bp != B else out


def collate_bow_doc(context_ids, vocab_size, pad_id=0):
    """Plain-JAX glue: (B, L) padded token ids -> (B, V) int32 count matrix; pad_id ignored.

    Uses scatter-add (no (B, L, V) one-hot blow-up).
    TODO(synk): token id == pad_id (a legitimate vocab row) is dropped; verify against the
                original PyTorch collate_bow_doc padding convention.
    """
    B, L = context_ids.shape
    mask = (context_ids != pad_id).astype(jnp.int32)
    rows = jnp.broadcast_to(jnp.arange(B)[:, None], (B, L))
    return jnp.zeros((B, vocab_size), jnp.int32).at[rows, context_ids].add(mask)


class ContextEncoderModelPallas:
    """Mirrors ContextEncoderModel.forward(context, doc) = WeightedSumEncoder(collate_bow_doc(context)).

    Store word_embeds in bf16 for best HBM-roofline behaviour (especially v5e); the kernel
    streams the table in its native dtype and accumulates in f32.
    """

    def __init__(self, word_embeds, use_cnts=False, idf=None, *, tile_v=None, tile_d=None):
        self.word_embeds = word_embeds
        self.use_cnts = use_cnts
        self.idf = idf
        self.tile_v = tile_v
        self.tile_d = tile_d

    def __call__(self, context_ids, doc=None):
        bow = collate_bow_doc(context_ids, self.word_embeds.shape[0])
        return weighted_sum_encoder(bow, self.word_embeds, self.idf, self.use_cnts,
                                    token_ids=context_ids,
                                    tile_v=self.tile_v, tile_d=self.tile_d)


if __name__ == "__main__":
    key = jax.random.PRNGKey(0)
    k_emb, k_idf, k_ctx, k_emb2, k_ctx2, k_emb4, k_idf4, k_ctx4 = jax.random.split(key, 8)

    VOCAB, EMBED_DIM = 512, 128
    BATCH, SEQ_LEN = 8, 16
    hp = jax.lax.Precision.HIGHEST

    word_embeds = jax.random.normal(k_emb, (VOCAB, EMBED_DIM), dtype=jnp.float32) * 0.02
    idf = jax.random.uniform(k_idf, (VOCAB,), minval=0.5, maxval=3.0, dtype=jnp.float32)
    context_ids = jax.random.randint(k_ctx, (BATCH, SEQ_LEN), minval=0, maxval=VOCAB)
    bow = collate_bow_doc(context_ids, VOCAB).astype(jnp.float32)

    # --- 1) f32 table, idf, binary bow (strict check) ---
    model = ContextEncoderModelPallas(word_embeds, use_cnts=False, idf=idf)
    out = jax.block_until_ready(model(context_ids))
    w = (bow > 0).astype(jnp.float32) * idf[None, :]
    ref = jnp.dot(w, word_embeds, precision=hp) / jnp.maximum(w.sum(-1, keepdims=True), 1e-9)
    assert out.shape == (BATCH, EMBED_DIM)
    assert jnp.allclose(out, ref, atol=1e-5, rtol=1e-5), "test1 mismatch"

    # --- 2) bf16 table streaming, count-weighted, no idf ---
    word_embeds_bf16 = word_embeds.astype(jnp.bfloat16)
    model_bf16 = ContextEncoderModelPallas(word_embeds_bf16, use_cnts=True, idf=None)
    out_bf16 = jax.block_until_ready(model_bf16(context_ids))
    ref2 = (jnp.dot(bow, word_embeds_bf16.astype(jnp.float32), precision=hp)
            / jnp.maximum(bow.sum(-1, keepdims=True), 1e-9))
    assert out_bf16.shape == (BATCH, EMBED_DIM)
    assert jnp.allclose(out_bf16, ref2, atol=1e-4, rtol=1e-4), "test2 mismatch"

    # --- 3) non-tile-multiple vocab (zero-padding path), B=4, idf ---
    VOCAB3 = 300
    word_embeds3 = jax.random.normal(k_emb2, (VOCAB3, EMBED_DIM), dtype=jnp.float32) * 0.02
    context_ids3 = jax.random.randint(k_ctx2, (4, 10), minval=1, maxval=VOCAB3)
    idf3 = idf[:VOCAB3]
    model3 = ContextEncoderModelPallas(word_embeds3, use_cnts=False, idf=idf3)
    out3 = jax.block_until_ready(model3(context_ids3))
    bow3 = collate_bow_doc(context_ids3, VOCAB3).astype(jnp.float32)
    w3 = (bow3 > 0).astype(jnp.float32) * idf3[None, :]
    ref3 = jnp.dot(w3, word_embeds3, precision=hp) / jnp.maximum(w3.sum(-1, keepdims=True), 1e-9)
    assert out3.shape == (4, EMBED_DIM)
    assert jnp.allclose(out3, ref3, atol=1e-5, rtol=1e-5), "test3 mismatch"

    # --- 4) block-sparse vocab tiles + D stripes (n_d=2), bf16 table, idf, counts ---
    VOCAB4, D4 = 4096, 256
    word_embeds4 = (jax.random.normal(k_emb4, (VOCAB4, D4), dtype=jnp.float32) * 0.02
                    ).astype(jnp.bfloat16)
    idf4 = jax.random.uniform(k_idf4, (VOCAB4,), minval=0.5, maxval=3.0, dtype=jnp.float32)
    context_ids4 = jax.random.randint(k_ctx4, (4, 12), minval=1024, maxval=2048)
    model4 = ContextEncoderModelPallas(word_embeds4, use_cnts=True, idf=idf4, tile_v=512)
    out4 = jax.block_until_ready(model4(context_ids4))
    bow4 = collate_bow_doc(context_ids4, VOCAB4).astype(jnp.float32)
    w4 = bow4 * idf4[None, :]
    ref4 = (jnp.dot(w4, word_embeds4.astype(jnp.float32), precision=hp)
            / jnp.maximum(w4.sum(-1, keepdims=True), 1e-9))
    assert out4.shape == (4, D4)
    assert jnp.allclose(out4, ref4, atol=1e-4, rtol=1e-4), "test4 mismatch"

    print("KERNEL_OK")
</pallas_src>

<mosaic_0001>
module attributes {stable_mosaic.version = 11 : i64} {
  func.func @_wsum_kernel(%arg0: i32, %arg1: i32, %arg2: i32, %arg3: memref<1xi32, #tpu.memory_space<smem>>, %arg4: memref<1xi32, #tpu.memory_space<smem>>, %arg5: memref<8x512xi32, #tpu.memory_space<vmem>>, %arg6: memref<1x512xf32, #tpu.memory_space<vmem>>, %arg7: memref<512x128xf32, #tpu.memory_space<vmem>>, %arg8: memref<8x128xf32, #tpu.memory_space<vmem>>, %arg9: memref<8x1xf32, #tpu.memory_space<vmem>>) attributes {dimension_semantics = [#tpu.dimension_semantics<parallel>, #tpu.dimension_semantics<parallel>, #tpu.dimension_semantics<arbitrary>], iteration_bounds = array<i64: 1, 1, 1>, scalar_prefetch = 2 : i64, scratch_operands = 1 : i64, tpu.core_type = #tpu.core_type<tc>, window_params = [{transform_indices = @transform_0, window_bounds = array<i64: 8, 512>}, {transform_indices = @transform_1, window_bounds = array<i64: 1, 512>}, {transform_indices = @transform_2, window_bounds = array<i64: 512, 128>}, {transform_indices = @transform_3, window_bounds = array<i64: 8, 128>}]} {
    %c0_i32 = arith.constant 0 : i32
    %0 = arith.cmpi eq, %arg2, %c0_i32 : i32
    %1 = arith.extui %0 : i1 to i32
    %c0_i32_0 = arith.constant 0 : i32
    %2 = arith.cmpi ne, %1, %c0_i32_0 : i32
    scf.if %2 {
      %cst = arith.constant 0.000000e+00 : f32
      %10 = vector.broadcast %cst : f32 to vector<8x128xf32>
      %c0_4 = arith.constant 0 : index
      %c0_5 = arith.constant 0 : index
      %11 = vector.load %arg8[%c0_4, %c0_5] : memref<8x128xf32, #tpu.memory_space<vmem>>, vector<8x128xf32>
      tpu.vector_store %arg8[%c0_4, %c0_5], %10 {strides = array<i32>} : memref<8x128xf32, #tpu.memory_space<vmem>>, vector<8x128xf32>,
      %cst_6 = arith.constant 0.000000e+00 : f32
      %12 = vector.broadcast %cst_6 : f32 to vector<8x1xf32>
      %c0_7 = arith.constant 0 : index
      %c0_8 = arith.constant 0 : index
      %13 = vector.load %arg9[%c0_7, %c0_8] : memref<8x1xf32, #tpu.memory_space<vmem>>, vector<8x1xf32>
      tpu.vector_store %arg9[%c0_7, %c0_8], %12 {strides = array<i32>} : memref<8x1xf32, #tpu.memory_space<vmem>>, vector<8x1xf32>,
    } else {
    }
    %c0 = arith.constant 0 : index
    %3 = memref.load %arg4[%c0] : memref<1xi32, #tpu.memory_space<smem>>
    %4 = arith.cmpi slt, %arg2, %3 : i32
    %5 = arith.extui %4 : i1 to i32
    %c0_i32_1 = arith.constant 0 : i32
    %6 = arith.cmpi ne, %5, %c0_i32_1 : i32
    scf.if %6 {
      %c0_4 = arith.constant 0 : index
      %c0_5 = arith.constant 0 : index
      %10 = vector.load %arg5[%c0_4, %c0_5] : memref<8x512xi32, #tpu.memory_space<vmem>>, vector<8x512xi32>
      %c0_i32_6 = arith.constant 0 : i32
      %11 = vector.broadcast %c0_i32_6 : i32 to vector<8x512xi32>
      %12 = arith.cmpi sgt, %10, %11 : vector<8x512xi32>
      %13 = arith.extui %12 : vector<8x512xi1> to vector<8x512xi32>
      %14 = arith.sitofp %13 : vector<8x512xi32> to vector<8x512xf32>
      %c0_7 = arith.constant 0 : index
      %c0_8 = arith.constant 0 : index
      %15 = vector.load %arg6[%c0_7, %c0_8] : memref<1x512xf32, #tpu.memory_space<vmem>>, vector<1x512xf32>
      %16 = vector.broadcast %15 : vector<1x512xf32> to vector<8x512xf32>
      %17 = arith.mulf %14, %16 : vector<8x512xf32>
      %c0_9 = arith.constant 0 : index
      %c0_10 = arith.constant 0 : index
      %18 = vector.load %arg7[%c0_9, %c0_10] : memref<512x128xf32, #tpu.memory_space<vmem>>, vector<512x128xf32>
      %c0_11 = arith.constant 0 : index
      %c0_12 = arith.constant 0 : index
      %19 = vector.load %arg8[%c0_11, %c0_12] : memref<8x128xf32, #tpu.memory_space<vmem>>, vector<8x128xf32>
      %cst = arith.constant dense<0.000000e+00> : vector<8x128xf32>
      %20 = tpu.matmul %17, %18, %cst {dimension_numbers = #tpu.dot_dimension_numbers<[1], [0], [0], [1], [0, 0, 1, 1], [], []>} : vector<8x512xf32>, vector<512x128xf32>, vector<8x128xf32> -> vector<8x128xf32>
      %21 = arith.addf %19, %20 : vector<8x128xf32>
      %c0_13 = arith.constant 0 : index
      %c0_14 = arith.constant 0 : index
      %22 = vector.load %arg8[%c0_13, %c0_14] : memref<8x128xf32, #tpu.memory_space<vmem>>, vector<8x128xf32>
      tpu.vector_store %arg8[%c0_13, %c0_14], %21 {strides = array<i32>} : memref<8x128xf32, #tpu.memory_space<vmem>>, vector<8x128xf32>,
      %c0_15 = arith.constant 0 : index
      %c0_16 = arith.constant 0 : index
      %23 = vector.load %arg9[%c0_15, %c0_16] : memref<8x1xf32, #tpu.memory_space<vmem>>, vector<8x1xf32>
      %cst_17 = arith.constant dense<0.000000e+00> : vector<8xf32>
      %24 = vector.multi_reduction <add>, %17, %cst_17 [1] : vector<8x512xf32> to vector<8xf32>
      %25 = vector.shape_cast %24 : vector<8xf32> to vector<8x1xf32>
      %26 = arith.addf %23, %25 : vector<8x1xf32>
      %c0_18 = arith.constant 0 : index
      %c0_19 = arith.constant 0 : index
      %27 = vector.load %arg9[%c0_18, %c0_19] : memref<8x1xf32, #tpu.memory_space<vmem>>, vector<8x1xf32>
      tpu.vector_store %arg9[%c0_18, %c0_19], %26 {strides = array<i32>} : memref<8x1xf32, #tpu.memory_space<vmem>>, vector<8x1xf32>,
    } else {
    }
    %c0_i32_2 = arith.constant 0 : i32
    %7 = arith.cmpi eq, %arg2, %c0_i32_2 : i32
    %8 = arith.extui %7 : i1 to i32
    %c0_i32_3 = arith.constant 0 : i32
    %9 = arith.cmpi ne, %8, %c0_i32_3 : i32
    scf.if %9 {
      %c0_4 = arith.constant 0 : index
      %c0_5 = arith.constant 0 : index
      %10 = vector.load %arg8[%c0_4, %c0_5] : memref<8x128xf32, #tpu.memory_space<vmem>>, vector<8x128xf32>
      %c0_6 = arith.constant 0 : index
      %c0_7 = arith.constant 0 : index
      %11 = vector.load %arg9[%c0_6, %c0_7] : memref<8x1xf32, #tpu.memory_space<vmem>>, vector<8x1xf32>
      %cst = arith.constant 9.99999971E-10 : f32
      %12 = vector.broadcast %cst : f32 to vector<8x1xf32>
      %13 = arith.maximumf %11, %12 : vector<8x1xf32>
      %14 = vector.broadcast %13 : vector<8x1xf32> to vector<8x128xf32>
      %15 = arith.divf %10, %14 : vector<8x128xf32>
      %c0_8 = arith.constant 0 : index
      %c0_9 = arith.constant 0 : index
      %16 = vector.load %arg8[%c0_8, %c0_9] : memref<8x128xf32, #tpu.memory_space<vmem>>, vector<8x128xf32>
      tpu.vector_store %arg8[%c0_8, %c0_9], %15 {strides = array<i32>} : memref<8x128xf32, #tpu.memory_space<vmem>>, vector<8x128xf32>,
    } else {
    }
    return
  }
  func.func @transform_0(%arg0: i32, %arg1: i32, %arg2: i32, %arg3: memref<1xi32, #tpu.memory_space<smem>>, %arg4: memref<1xi32, #tpu.memory_space<smem>>) -> (i32, i32) {
    %0 = arith.index_cast %arg2 : i32 to index
    %1 = memref.load %arg3[%0] : memref<1xi32, #tpu.memory_space<smem>>
    %c0_i32 = arith.constant 0 : i32
    return %arg0, %1 : i32, i32
  }
  func.func @transform_1(%arg0: i32, %arg1: i32, %arg2: i32, %arg3: memref<1xi32, #tpu.memory_space<smem>>, %arg4: memref<1xi32, #tpu.memory_space<smem>>) -> (i32, i32) {
    %0 = arith.index_cast %arg2 : i32 to index
    %1 = memref.load %arg3[%0] : memref<1xi32, #tpu.memory_space<smem>>
    %c0_i32 = arith.constant 0 : i32
    %c0_i32_0 = arith.constant 0 : i32
    return %c0_i32, %1 : i32, i32
  }
  func.func @transform_2(%arg0: i32, %arg1: i32, %arg2: i32, %arg3: memref<1xi32, #tpu.memory_space<smem>>, %arg4: memref<1xi32, #tpu.memory_space<smem>>) -> (i32, i32) {
    %0 = arith.index_cast %arg2 : i32 to index
    %1 = memref.load %arg3[%0] : memref<1xi32, #tpu.memory_space<smem>>
    %c0_i32 = arith.constant 0 : i32
    %c0_i32_0 = arith.constant 0 : i32
    return %1, %c0_i32 : i32, i32
  }
  func.func @transform_3(%arg0: i32, %arg1: i32, %arg2: i32, %arg3: memref<1xi32, #tpu.memory_space<smem>>, %arg4: memref<1xi32, #tpu.memory_space<smem>>) -> (i32, i32) {
    %c0_i32 = arith.constant 0 : i32
    return %arg0, %arg1 : i32, i32
  }
}

</mosaic_0001>

<bundles_post_ra>
// kernel: tpu_custom_call.1
= control target key start
LH: loop header
LB: loop body
LE: loop exit
PB: predicated region body
PF: predicated region fallthrough
CT: control target
= control target key end

     0   :  { %12 = vsyncpa [#allocation7], 0  ;;  %s710_s0 = inlined_call_operand.<no memory space> [shape: s32[1], index: 0, kind: input, shape index: {}]   ;;  %s711_s1 = inlined_call_operand.<no memory space> [shape: s32[1], index: 1, kind: input, shape index: {}]   ;;  %s712_s2 = inlined_call_operand.hbm [shape: s32[8,512], index: 2, kind: input, shape index: {}]   ;;  %s713_s3 = inlined_call_operand.vmem [shape: f32[1,512], index: 3, kind: input, shape index: {}]   ;;  %s714_s4 = inlined_call_operand.hbm [shape: f32[512,128], index: 4, kind: input, shape index: {}]   ;;  %s715_s5 = inlined_call_operand.hbm [shape: f32[8,128], index: 5, kind: output, shape index: {}]  }
   0x1   :  { %13 = vsyncpa [#allocation10], 0 }
   0x2   :  { %14 = vsyncpa [#allocation8], 0  ;;  %s394_s20 = sshll.u32 %s710_s0, 9  ;;  %s617_s24 = smov [#allocation6]  }
   0x3   :  { %s23_s23 = scalar_lea.hbm %s712_s2, %s394_s20  ;;  %s25_s25 = sshll.u32 %s617_s24, 4  ;;  %s26_s25 = int_to_ptr.vmem [resolvable:$true] %s25_s25 }
   0x4   :  { %s395_s28 = sshll.u32 %s710_s0, 13  ;;  %s541_s29 = scalar_lea.hbm %s23_s23, 512 }
   0x5   :  { %p542_p0 = scmp.ne.s32.totalorder %s23_s23, %s541_s29  ;;  %s543_s7 = scalar_lea.hbm %s712_s2, 512 }
   0x6   :  { %p544_p1 = scmp.lt.u32.totalorder %s23_s23, %s712_s2  ;;  %p545_p2 = scmp.lt.u32.totalorder %s543_s7, %s541_s29 }
   0x7   :  { %p547_p4 = scmp.lt.u32.totalorder %s541_s29, %s23_s23 }
   0x8   :  { %p546_p3 = por %p545_p2, %p544_p1 }
   0xa   :  { %p548_p5 = por %p547_p4, %p546_p3 }
   0xc   :  { %p549_p6 = pnand %p548_p5, %p542_p0 }
   0xe   :  { %552 = shalt.err (!%p549_p6)
}
   0xf   :  { %s553_s10 = scalar_lea.vmem %s26_s25, 512  ;;  %p558_p8 = scmp.lt.s32.totalorder %s26_s25, %s26_s25 }
  0x10   :  { %p554_p7 = scmp.ne.s32.totalorder %s26_s25, %s553_s10  ;;  %p559_p9 = scmp.lt.s32.totalorder %s553_s10, %s553_s10 }
  0x12   :  { %p560_p10 = por %p559_p9, %p558_p8 }
  0x14   :  { %p561_p11 = pnand %p560_p10, %p554_p7 }
  0x16   :  { %564 = shalt.err (!%p561_p11)
}
  0x17   :  { %28 = dma.hbm_to_vmem [thread:$0]  %s23_s23, 512, %s26_s25, [#allocation7]  }
  0x18   :  { %s46_s13 = scalar_lea.hbm %s714_s4, %s395_s28  ;;  %s618_s14 = smov [#allocation9]  }
  0x19   :  { %s47_s2 = sshll.u32 %s618_s14, 4  ;;  %s565_s15 = scalar_lea.hbm %s46_s13, 8192  ;;  %s48_s2 = int_to_ptr.vmem [resolvable:$true] %s47_s2 }
  0x1a   :  { %p566_p12 = scmp.ne.s32.totalorder %s46_s13, %s565_s15  ;;  %s567_s18 = scalar_lea.hbm %s714_s4, 8192 }
  0x1b   :  { %p568_p13 = scmp.lt.u32.totalorder %s46_s13, %s714_s4  ;;  %p569_p0 = scmp.lt.u32.totalorder %s567_s18, %s565_s15 }
  0x1c   :  { %p571_p2 = scmp.lt.u32.totalorder %s565_s15, %s46_s13 }
  0x1d   :  { %p570_p1 = por %p569_p0, %p568_p13 }
  0x1f   :  { %p572_p3 = por %p571_p2, %p570_p1 }
  0x21   :  { %p573_p4 = pnand %p572_p3, %p566_p12 }
  0x23   :  { %576 = shalt.err (!%p573_p4)
}
  0x24   :  { %s577_s21 = scalar_lea.vmem %s48_s2, 8192  ;;  %p582_p6 = scmp.lt.s32.totalorder %s48_s2, %s48_s2 }
  0x25   :  { %p578_p5 = scmp.ne.s32.totalorder %s48_s2, %s577_s21  ;;  %p583_p7 = scmp.lt.s32.totalorder %s577_s21, %s577_s21 }
  0x27   :  { %p584_p8 = por %p583_p7, %p582_p6 }
  0x29   :  { %p585_p9 = pnand %p584_p8, %p578_p5 }
  0x2b   :  { %588 = shalt.err (!%p585_p9)
}
  0x2c   :  { %s619_s22 = smov 128   ;;  %s620_s23 = smov 8  }
  0x2d   :  { %53 = dma.hbm_to_vmem [thread:$0]  %s46_s13, 8192, %s48_s2, [#allocation10], %s619_s22, %s619_s22, %s620_s23  }
  0x2e   :  { %611 = dma.done.wait [#allocation7], 512  }
  0x2f   :  { %612 = vsyncadd [#allocation7], 4294966784 }
  0x30   :  { %613 = dma.done.wait [#allocation10], 8192  }
  0x31   :  { %614 = vsyncadd [#allocation10], 4294959104  ;;  %s387_s25 = sshll.u32 %s710_s0, 2  ;;  %vm81_vm0 = vcmask 7168   ;;  %v621_v0 = vmov 0.0   ;;  %p389_p11 = scmp.le.s32.totalorder %s711_s1, 0 }
  0x32   :  { %p69_p10 = scmp.lt.s32.totalorder %s387_s25, 3  ;;  %80 = vst [vmem:[#allocation11] sm:$0xff] %v621_v0  ;;  %82 = vst.msk [vmem:[#allocation2] sm:$0xff] %vm81_vm0, %v621_v0  ;;  %v146_v1 = vld [vmem:[#allocation9 + $0x80] sm:$0xff] (!%p389_p11)  ;;  %v147_v2 = vld [vmem:[#allocation9 + $0x88] sm:$0xff] (!%p389_p11)  ;;  %v106_v51 = vlaneseq (!%p389_p11) }
  0x33   :  { %87 = sbr.rel (%p389_p11) target bundleno = 307 (0x133), region = 29  ;;  %v178_v3 = vld [vmem:[#allocation9 + $0x180] sm:$0xff] (!%p389_p11)  ;;  %v466_v4 = vpack.c.bf16 (!%p389_p11), %v147_v2, %v146_v1  ;;  %v179_v5 = vld [vmem:[#allocation9 + $0x188] sm:$0xff] (!%p389_p11)  ;;  %v148_v12 = vld [vmem:[#allocation9 + $0x90] sm:$0xff] (!%p389_p11) }
  0x34   :  { %s717_s25 = smov (!%p69_p10, %s387_s25), 3  ;;  %v130_v6 = vld [vmem:[#allocation9] sm:$0xff] (!%p389_p11)  ;;  %v131_v7 = vld [vmem:[#allocation9 + $0x8] sm:$0xff] (!%p389_p11)  ;;  %v498_v8 = vpack.c.bf16 (!%p389_p11), %v179_v5, %v178_v3  ;;  %v149_v14 = vld [vmem:[#allocation9 + $0x98] sm:$0xff] (!%p389_p11)  ;;  %v107_v2 = vshrl.u32 (!%p389_p11), %v106_v51, 7 }
  0x35   :  { %s71_s28 = scalar_lea.vmem %s713_s3, %s717_s25  ;;  %v468_v9 = vpack.c.bf16 (!%p389_p11), %v131_v7, %v130_v6  ;;  %v162_v10 = vld [vmem:[#allocation9 + $0x100] sm:$0xff] (!%p389_p11)  ;;  %v163_v11 = vld [vmem:[#allocation9 + $0x108] sm:$0xff] (!%p389_p11)  ;;  %467 = vmatprep.subr.bf16.mxu0 (!%p389_p11), %v466_v4  ;;  %v180_v15 = vld [vmem:[#allocation9 + $0x190] sm:$0xff] (!%p389_p11)  ;;  %v470_v17 = vpack.c.bf16 (!%p389_p11), %v149_v14, %v148_v12 }
  0x36   :  { %v500_v13 = vpack.c.bf16 (!%p389_p11), %v163_v11, %v162_v10  ;;  %v181_v16 = vld [vmem:[#allocation9 + $0x198] sm:$0xff] (!%p389_p11)  ;;  %499 = vmatprep.subr.bf16.mxu1 (!%p389_p11), %v498_v8  ;;  %v132_v19 = vld [vmem:[#allocation9 + $0x10] sm:$0xff] (!%p389_p11)  ;;  %v150_v24 = vld [vmem:[#allocation9 + $0xa0] sm:$0xff] (!%p389_p11) }
  0x37   :  { %469 = vmatpush3.bf16.msra.mxu0 (!%p389_p11), %v468_v9  ;;  %v502_v18 = vpack.c.bf16 (!%p389_p11), %v181_v16, %v180_v15  ;;  %v133_v20 = vld [vmem:[#allocation9 + $0x18] sm:$0xff] (!%p389_p11)  ;;  %v164_v21 = vld [vmem:[#allocation9 + $0x110] sm:$0xff] (!%p389_p11)  ;;  %v151_v25 = vld [vmem:[#allocation9 + $0xa8] sm:$0xff] (!%p389_p11) }
  0x38   :  { %501 = vmatpush3.bf16.msra.mxu1 (!%p389_p11), %v500_v13  ;;  %v472_v22 = vpack.c.bf16 (!%p389_p11), %v133_v20, %v132_v19  ;;  %v165_v23 = vld [vmem:[#allocation9 + $0x118] sm:$0xff] (!%p389_p11)  ;;  %471 = vmatprep.subr.bf16.mxu0 (!%p389_p11), %v470_v17  ;;  %v474_v27 = vpack.c.bf16 (!%p389_p11), %v151_v25, %v150_v24  ;;  %v182_v28 = vld [vmem:[#allocation9 + $0x1a0] sm:$0xff] (!%p389_p11)  ;;  %v183_v29 = vld [vmem:[#allocation9 + $0x1a8] sm:$0xff] (!%p389_p11)  ;;  %v108_v19 = vsub.s32 (!%p389_p11), 0, %v107_v2  ;;  %v112_v20 = vsub.s32 (!%p389_p11), 1, %v107_v2 }
  0x39   :  { %503 = vmatprep.subr.bf16.mxu1 (!%p389_p11), %v502_v18  ;;  %v504_v26 = vpack.c.bf16 (!%p389_p11), %v165_v23, %v164_v21  ;;  %v134_v30 = vld [vmem:[#allocation9 + $0x20] sm:$0xff] (!%p389_p11)  ;;  %v506_v31 = vpack.c.bf16 (!%p389_p11), %v183_v29, %v182_v28  ;;  %v135_v32 = vld [vmem:[#allocation9 + $0x28] sm:$0xff] (!%p389_p11)  ;;  %v152_v36 = vld [vmem:[#allocation9 + $0xb0] sm:$0xff] (!%p389_p11)  ;;  %v120_v23 = vsub.s32 (!%p389_p11), 3, %v107_v2  ;;  %v116_v24 = vsub.s32 (!%p389_p11), 2, %v107_v2 }
  0x3a   :  { %v166_v33 = vld [vmem:[#allocation9 + $0x120] sm:$0xff]  ;;  %v167_v34 = vld [vmem:[#allocation9 + $0x128] sm:$0xff]  ;;  %v476_v35 = vpack.c.bf16 %v135_v32, %v134_v30  ;;  %v153_v37 = vld [vmem:[#allocation9 + $0xb8] sm:$0xff] }
  0x3b   :  { %473 = vmatpush3.bf16.msra.mxu0 %v472_v22  ;;  %v184_v38 = vld [vmem:[#allocation9 + $0x1b0] sm:$0xff]  ;;  %v508_v39 = vpack.c.bf16 %v167_v34, %v166_v33  ;;  %v478_v40 = vpack.c.bf16 %v153_v37, %v152_v36  ;;  %v185_v41 = vld [vmem:[#allocation9 + $0x1b8] sm:$0xff]  ;;  %v154_v47 = vld [vmem:[#allocation9 + $0xc0] sm:$0xff]  ;;  %v622_v37 = vmov 0.0  }
  0x3c   :  { %505 = vmatpush3.bf16.msra.mxu1 %v504_v26  ;;  %475 = vmatprep.subr.bf16.mxu0 %v474_v27  ;;  %v136_v42 = vld [vmem:[#allocation9 + $0x30] sm:$0xff]  ;;  %v137_v43 = vld [vmem:[#allocation9 + $0x38] sm:$0xff]  ;;  %v510_v44 = vpack.c.bf16 %v185_v41, %v184_v38  ;;  %v155_v48 = vld [vmem:[#allocation9 + $0xc8] sm:$0xff] }
  0x3d   :  { %507 = vmatprep.subr.bf16.mxu1 %v506_v31  ;;  %v168_v45 = vld [vmem:[#allocation9 + $0x130] sm:$0xff]  ;;  %v169_v46 = vld [vmem:[#allocation9 + $0x138] sm:$0xff]  ;;  %v186_v49 = vld [vmem:[#allocation9 + $0x1c0] sm:$0xff]  ;;  %v480_v52 = vpack.c.bf16 %v137_v43, %v136_v42  ;;  %v482_v55 = vpack.c.bf16 %v155_v48, %v154_v47 }
  0x3e   :  { %v187_v50 = vld [vmem:[#allocation9 + $0x1c8] sm:$0xff]  ;;  %v138_v53 = vld [vmem:[#allocation9 + $0x40] sm:$0xff]  ;;  %v512_v54 = vpack.c.bf16 %v169_v46, %v168_v45  ;;  %v156_v60 = vld [vmem:[#allocation9 + $0xd0] sm:$0xff] }
  0x3f   :  { %477 = vmatpush3.bf16.msra.mxu0 %v476_v35  ;;  %v139_v56 = vld [vmem:[#allocation9 + $0x48] sm:$0xff]  ;;  %v170_v57 = vld [vmem:[#allocation9 + $0x140] sm:$0xff]  ;;  %v514_v59 = vpack.c.bf16 %v187_v50, %v186_v49  ;;  %v157_v61 = vld [vmem:[#allocation9 + $0xd8] sm:$0xff] }
  0x40   :  { %509 = vmatpush3.bf16.msra.mxu1 %v508_v39  ;;  %479 = vmatprep.subr.bf16.mxu0 %v478_v40  ;;  %v171_v58 = vld [vmem:[#allocation9 + $0x148] sm:$0xff]  ;;  %v188_v62 = vld [vmem:[#allocation9 + $0x1d0] sm:$0xff]  ;;  %v189_v63 = vld [vmem:[#allocation9 + $0x1d8] sm:$0xff]  ;;  %v484_v3 = vpack.c.bf16 %v139_v56, %v138_v53  ;;  %v486_v8 = vpack.c.bf16 %v157_v61, %v156_v60 }
  0x41   :  { %511 = vmatprep.subr.bf16.mxu1 %v510_v44  ;;  %v140_v0 = vld [vmem:[#allocation9 + $0x50] sm:$0xff]  ;;  %v141_v1 = vld [vmem:[#allocation9 + $0x58] sm:$0xff]  ;;  %v158_v6 = vld [vmem:[#allocation9 + $0xe0] sm:$0xff]  ;;  %v516_v7 = vpack.c.bf16 %v171_v58, %v170_v57  ;;  %v518_v12 = vpack.c.bf16 %v189_v63, %v188_v62 }
  0x42   :  { %v172_v4 = vld [vmem:[#allocation9 + $0x150] sm:$0xff]  ;;  %v173_v5 = vld [vmem:[#allocation9 + $0x158] sm:$0xff]  ;;  %v159_v9 = vld [vmem:[#allocation9 + $0xe8] sm:$0xff]  ;;  %v488_v21 = vpack.c.bf16 %v141_v1, %v140_v0 }
  0x43   :  { %481 = vmatpush3.bf16.msra.mxu0 %v480_v52  ;;  %v190_v10 = vld [vmem:[#allocation9 + $0x1e0] sm:$0xff]  ;;  %v191_v11 = vld [vmem:[#allocation9 + $0x1e8] sm:$0xff]  ;;  %v160_v17 = vld [vmem:[#allocation9 + $0xf0] sm:$0xff]  ;;  %v520_v22 = vpack.c.bf16 %v173_v5, %v172_v4  ;;  %v490_v25 = vpack.c.bf16 %v159_v9, %v158_v6 }
  0x44   :  { %513 = vmatpush3.bf16.msra.mxu1 %v512_v54  ;;  %483 = vmatprep.subr.bf16.mxu0 %v482_v55  ;;  %v142_v13 = vld [vmem:[#allocation9 + $0x60] sm:$0xff]  ;;  %v143_v14 = vld [vmem:[#allocation9 + $0x68] sm:$0xff]  ;;  %v161_v18 = vld [vmem:[#allocation9 + $0xf8] sm:$0xff]  ;;  %v522_v26 = vpack.c.bf16 %v191_v11, %v190_v10 }
  0x45   :  { %515 = vmatprep.subr.bf16.mxu1 %v514_v59  ;;  %v174_v15 = vld [vmem:[#allocation9 + $0x160] sm:$0xff]  ;;  %v175_v16 = vld [vmem:[#allocation9 + $0x168] sm:$0xff]  ;;  %v492_v27 = vpack.c.bf16 %v143_v14, %v142_v13  ;;  %v494_v31 = vpack.c.bf16 %v161_v18, %v160_v17  ;;  %v104_v32 = vld [vmem:[%s71_s28] sm:$0xf] }
  0x46   :  { %v88_v28 = vld [vmem:[#allocation6] sm:$0xff]  ;;  %v89_v29 = vld [vmem:[#allocation6 + $0x8] sm:$0xff]  ;;  %v524_v30 = vpack.c.bf16 %v175_v16, %v174_v15  ;;  %v91_v33 = vld [vmem:[#allocation6 + $0x18] sm:$0xff]  ;;  %v109_v40 = vrot.slane %v104_v32, %v108_v19  ;;  %v113_v41 = vrot.slane %v104_v32, %v112_v20  ;;  %v121_v42 = vrot.slane %v104_v32, %v120_v23 }
  0x47   :  { %485 = vmatpush3.bf16.msra.mxu0 %v484_v3  ;;  %vm92_vm1 = vcmp.gt.s32.totalorder %v88_v28, 0  ;;  %vm93_vm2 = vcmp.gt.s32.totalorder %v89_v29, 0  ;;  %v90_v34 = vld [vmem:[#allocation6 + $0x10] sm:$0xff]  ;;  %v193_v36 = vld [vmem:[#allocation9 + $0x1f8] sm:$0xff]  ;;  %vm95_vm3 = vcmp.gt.s32.totalorder %v91_v33, 0  ;;  %v117_v43 = vrot.slane %v104_v32, %v116_v24  ;;  %v194_v5 = vld [vmem:[#allocation11] sm:$0xff] }
  0x48   :  { %517 = vmatpush3.bf16.msra.mxu1 %v516_v7  ;;  %487 = vmatprep.subr.bf16.mxu0 %v486_v8  ;;  %v192_v35 = vld [vmem:[#allocation9 + $0x1f0] sm:$0xff]  ;;  %v390_v38 = vsel %vm92_vm1, 1.0, %v622_v37  ;;  %v391_v39 = vsel %vm93_vm2, 1.0, %v622_v37  ;;  %vm94_vm4 = vcmp.gt.s32.totalorder %v90_v34, 0  ;;  %v145_v45 = vld [vmem:[#allocation9 + $0x78] sm:$0xff]  ;;  %v393_v48 = vsel %vm95_vm3, 1.0, %v622_v37 }
  0x49   :  { %519 = vmatprep.subr.bf16.mxu1 %v518_v12  ;;  %v144_v44 = vld [vmem:[#allocation9 + $0x70] sm:$0xff]  ;;  %v126_v46 = vmul.f32 %v390_v38, %v109_v40  ;;  %v127_v47 = vmul.f32 %v391_v39, %v113_v41  ;;  %v392_v49 = vsel %vm94_vm4, 1.0, %v622_v37  ;;  %v526_v50 = vpack.c.bf16 %v193_v36, %v192_v35  ;;  %v177_v52 = vld [vmem:[#allocation9 + $0x178] sm:$0xff] }
  0x4a   :  { %v176_v51 = vld [vmem:[#allocation9 + $0x170] sm:$0xff]  ;;  %v129_v53 = vmul.f32 %v393_v48, %v121_v42  ;;  %v128_v55 = vmul.f32 %v392_v49, %v117_v43  ;;  %v496_v56 = vpack.c.bf16 %v145_v45, %v144_v44  ;;  %v337_v60 = vld [vmem:[#allocation2] sm:$0xff] }
  0x4b   :  { %489 = vmatpush3.bf16.msra.mxu0 %v488_v21  ;;  %259 = vmatprep.mubr.f32.mxu0 %v127_v47  ;;  %v338_v54 = vadd.f32 %v127_v47, %v126_v46  ;;  %v528_v57 = vpack.c.bf16 %v177_v52, %v176_v51 }
  0x4c   :  { %521 = vmatpush3.bf16.msra.mxu1 %v520_v22  ;;  %491 = vmatprep.subr.bf16.mxu0 %v490_v25 }
  0x4d   :  { %523 = vmatprep.subr.bf16.mxu1 %v522_v26  ;;  %329 = vmatprep.mubr.f32.mxu1 %v129_v53  ;;  %v339_v58 = vadd.f32 %v338_v54, %v128_v55 }
  0x4f   :  { %493 = vmatpush3.bf16.msra.mxu0 %v492_v27  ;;  %v340_v59 = vadd.f32 %v339_v58, %v129_v53 }
  0x50   :  { %525 = vmatpush3.bf16.msra.mxu1 %v524_v30  ;;  %495 = vmatprep.subr.bf16.mxu0 %v494_v31 }
  0x51   :  { %527 = vmatprep.subr.bf16.mxu1 %v526_v50  ;;  %341 = vadd.xlane.f32.xlu0 %v340_v59 }
  0x53   :  { %497 = vmatpush3.bf16.msra.mxu0 %v496_v56 }
  0x54   :  { %529 = vmatpush3.bf16.msra.mxu1 %v528_v57 }
  0x56   :  { %260 = vmatmul.mubr.f32.vlgmr.msra.gmra.mrb[0].mxu0 %v126_v46 }
  0x57   :  { %330 = vmatmul.mubr.f32.vlgmr.msra.gmra.mrb[0].mxu1 %v128_v55 }
  0xde   :  { %v342_v61 = vpop.xlane.xlu0 %341 }
  0xdf   :  { %v343_v62 = vadd.f32 %v342_v61, %v337_v60 }
  0xe1   :  { %345 = vst.msk [vmem:[#allocation2] sm:$0xff] %vm81_vm0, %v343_v62 }
 0x129   :  { %v428_v63 = vpop.f32.mrb[0].mxu0 }
 0x12a   :  { %v463_v0 = vpop.f32.mrb[0].mxu1  ;;  %v429_v1 = vpop.f32.mrb[1].mxu0 }
 0x12b   :  { %v430_v2 = vadd.f32 %v429_v1, %v428_v63  ;;  %v464_v3 = vpop.f32.mrb[1].mxu1 }
 0x12c   :  { %v465_v4 = vadd.f32 %v464_v3, %v463_v0 }
 0x12e   :  { %v332_v6 = vadd.f32 %v465_v4, %v430_v2 }
 0x130   :  { %v335_v7 = vadd.f32 %v332_v6, %v194_v5 }
 0x132   :  { %336 = vst [vmem:[#allocation11] sm:$0xff] %v335_v7 }
 0x133 PF:  { %v350_v8 = vld [vmem:[#allocation2] sm:$0xff]  ;;  %v623_v9 = vmov 0   ;;  %s624_s3 = smov [#allocation11]  }
 0x134   :  { %538 = vset.pattern.permute.xlu0 %v623_v9  ;;  %v351_v10 = vmax.f32 %v350_v8, 1e-09  ;;  %s366_s6 = sshll.u32 %s624_s3, 4  ;;  %s367_s6 = int_to_ptr.vmem [resolvable:$true] %s366_s6 }
 0x135   :  { %s589_s7 = scalar_lea.vmem %s367_s6, 128  ;;  %p594_p13 = scmp.lt.s32.totalorder %s367_s6, %s367_s6 }
 0x136   :  { %354 = vperm.xlu0 %538, %v351_v10   ;;  %p590_p12 = scmp.ne.s32.totalorder %s367_s6, %s589_s7  ;;  %p595_p0 = scmp.lt.s32.totalorder %s589_s7, %s589_s7 }
 0x138   :  { %p596_p1 = por %p595_p0, %p594_p13 }
 0x139   :  { %v349_v12 = vld [vmem:[#allocation11] sm:$0xff] }
 0x13a   :  { %p597_p2 = pnand %p596_p1, %p590_p12 }
 0x1b5   :  { %v355_v11 = vpop.permute.xlu0 %354 }
 0x1b6   :  { %539 = vrcp.f32 %v355_v11 }
 0x1c0   :  { %v540_v13 = vpop.eup %539 }
 0x1c1   :  { %v358_v14 = vmul.f32 %v540_v13, %v349_v12 }
 0x1c3   :  { %359 = vst [vmem:[#allocation11] sm:$0xff] %v358_v14 }
 0x1c4   :  { %600 = shalt.err (!%p597_p2)
}
 0x1c5   :  { %s601_s10 = scalar_lea.hbm %s715_s5, 128 }
 0x1c6   :  { %p602_p3 = scmp.ne.s32.totalorder %s715_s5, %s601_s10  ;;  %p605_p4 = scmp.lt.u32.totalorder %s601_s10, %s715_s5 }
 0x1c8   :  { %p607_p5 = pnand %p605_p4, %p602_p3 }
 0x1ca   :  { %610 = shalt.err (!%p607_p5)
}
 0x1cb   :  { %369 = dma.vmem_to_hbm [thread:$0]  %s367_s6, 128, %s715_s5, [#allocation8]  }
 0x1cc   :  { %615 = dma.done.wait [#allocation8], 128  }
 0x1cd   :  { %616 = vsyncadd [#allocation8], 4294967168 }
 0x1ce   :  { %373 = vsyncpa [#allocation7], 1 }
 0x1cf   :  { %374 = vsyncpa [#allocation10], 1 }
 0x1d0   :  { %375 = vsyncpa [#allocation8], 1 }

</bundles_post_ra>
